<compile_context>
chip_gen: v7x
topology: tpu7x:2x2x1
jax: 0.10.0
libtpu: 0.0.40
codegen_flags: <defaults>
</compile_context>

<pallas_src>
import functools
import math

import numpy as np

import jax
import jax.numpy as jnp
from jax.experimental import pallas as pl
from jax.experimental.pallas import tpu as pltpu


LOG_FLOOR_VALUE = 1e-5  # pydrobert.speech.config.LOG_FLOOR_VALUE


def _round_up(x: int, m: int) -> int:
    return ((x + m - 1) // m) * m


def _num_tensorcores() -> int:
    """Best-effort TensorCore count (v7x has 2/chip; v5e/v6e have 1)."""
    try:
        dev = jax.devices()[0]
        for attr in ("num_cores", "core_count", "num_tensorcores"):
            val = getattr(dev, attr, None)
            if isinstance(val, int) and val > 0:
                return val
        info = pltpu.get_tpu_info()
        for attr in ("num_cores", "core_count", "tensorcore_count"):
            val = getattr(info, attr, None)
            if isinstance(val, int) and val > 0:
                return val
    except Exception:
        pass
    return 1


def _choose_frame_tile(num_frames: int, per_frame_bytes: int, const_bytes: int,
                       num_cores: int, budget_bytes: int = 20 << 20,
                       cap: int = 1024) -> int:
    """Largest frame tile that fits the VMEM budget; split only if >1 core."""
    tile = min(cap, _round_up(num_frames, 8))
    if num_cores > 1 and num_frames >= 2 * 256:
        per_core = -(-num_frames // num_cores)
        tile = min(tile, max(256, _round_up(per_core, 8)))
    while tile > 8 and const_bytes + tile * per_frame_bytes > budget_bytes:
        tile = max(8, _round_up(tile // 2, 8))
    return max(8, tile)


def _stft_kernel(frames_ref, dft_ref, wfilt_ref, out_ref, *,
                 frame_length, nbins_pad, use_power, apply_log,
                 include_energy, eps):
    # frames_ref : (tile, L_PAD)              raw (un-windowed, zero-padded) frames
    # dft_ref    : (L_PAD, 2*NBINS_PAD)       window-folded [cos | -sin] DFT matrix
    # wfilt_ref  : (NBINS_PAD, F_PAD)         dense filterbank weights
    x = frames_ref[...]

    # Real DFT of the windowed frame via ONE MXU matmul (fused cos|sin, f32 acc).
    ri = jnp.dot(x, dft_ref[...], preferred_element_type=jnp.float32)
    re = ri[:, :nbins_pad]          # 128-lane aligned slices: free
    im = ri[:, nbins_pad:]
    pspec = re * re + im * im
    spec = pspec if use_power else jnp.sqrt(pspec)

    # Filterbank: one more MXU matmul (lane-dense F_PAD output).
    y = jnp.dot(spec.astype(wfilt_ref.dtype), wfilt_ref[...],
                preferred_element_type=jnp.float32)

    if include_energy:
        xf = x.astype(jnp.float32)
        e2 = jnp.sum(xf * xf, axis=1, keepdims=True) * (1.0 / frame_length)
        energy = e2 if use_power else jnp.sqrt(e2)
        col0 = (jax.lax.broadcasted_iota(jnp.int32, (1, y.shape[1]), 1) == 0)
        y = y + energy * col0.astype(jnp.float32)   # lands in column 0 only

    if apply_log:
        y = jnp.log(jnp.maximum(y, eps))

    out_ref[...] = y.astype(out_ref.dtype)


def stft_frame_computer(signal, *, offsets, filters, frame_length, frame_shift,
                        window=None, dft_size=None, centered=True,
                        use_log=True, use_power=False, include_energy=False,
                        kaldi_shift=False, is_real=False,
                        eps=LOG_FLOOR_VALUE, matmul_dtype=jnp.bfloat16,
                        frame_tile=None, pad_output=False):
    """Pallas equivalent of PyTorchShortTimeFourierTransformFrameComputer.forward."""
    signal = jnp.asarray(signal)
    out_dtype = signal.dtype
    sig_len = int(signal.shape[0])
    num_filts = len(filters)
    ncoeff = num_filts + (1 if include_energy else 0)

    if dft_size is None:
        dft_size = 1 << int(math.ceil(math.log2(frame_length)))
    if dft_size < frame_length:
        raise ValueError(f"expected dft_size >= {frame_length}; got {dft_size}")
    nbins = dft_size // 2 + 1

    if sig_len < frame_length // 2 + 1:
        return jnp.zeros((0, num_filts), out_dtype)   # matches the torch module

    # ---- framing (symmetric pad + overlapping strided slices) ---------------
    if not centered:
        pad_left = 0
    elif kaldi_shift:
        pad_left = frame_length // 2 - frame_shift // 2
    else:
        pad_left = (frame_length + 1) // 2 - 1
    num_frames = max(0, (sig_len + frame_shift // 2) // frame_shift)
    if num_frames == 0:
        return jnp.zeros((0, ncoeff), out_dtype)
    total_len = (num_frames - 1) * frame_shift - pad_left + frame_length
    pad_right = max(0, total_len - sig_len)
    # NOTE: sig[:pad_left].flip / sig[sig_len-pad_right:].flip exactly mirrors
    # the torch module's padding (symmetric-style, edge sample included).
    padded = jnp.concatenate([
        jnp.flip(signal[:pad_left]),
        signal,
        jnp.flip(signal[sig_len - pad_right:]),
    ]).astype(matmul_dtype)
    idx = (jnp.arange(num_frames)[:, None] * frame_shift
           + jnp.arange(frame_length)[None, :])
    frames = padded[idx]                                  # (num_frames, L)

    # ---- static operator tensors (built once, host side) --------------------
    L_PAD = _round_up(frame_length, 128)
    NBINS_PAD = _round_up(nbins, 128)
    F_PAD = _round_up(ncoeff, 128)

    if window is None:
        window_np = np.ones((frame_length,), np.float64)
    else:
        window_np = np.asarray(window, np.float64).reshape(frame_length)

    jj = np.arange(frame_length, dtype=np.float64)[:, None]
    kk = np.arange(NBINS_PAD, dtype=np.float64)[None, :]
    ang = 2.0 * np.pi * jj * kk / dft_size
    cmat = np.cos(ang) * window_np[:, None]
    smat = -np.sin(ang) * window_np[:, None]
    cmat[:, nbins:] = 0.0
    smat[:, nbins:] = 0.0
    dftmat = np.zeros((L_PAD, 2 * NBINS_PAD), np.float32)
    dftmat[:frame_length, :NBINS_PAD] = cmat
    dftmat[:frame_length, NBINS_PAD:] = smat

    # Dense filterbank weight matrix.  Bins past the half spectrum fold back
    # onto their Hermitian mirror (|conj(X)| == |X| for real signals),
    # replicating the conjugate-segment loop of the reference.
    scale = 2.0 if is_real else 1.0
    col0 = 1 if include_energy else 0
    wfilt = np.zeros((NBINS_PAD, F_PAD), np.float32)
    for j, (off, filt) in enumerate(zip(offsets, filters)):
        mag = np.abs(np.asarray(filt)).astype(np.float64)
        taps = mag * mag if use_power else mag
        for c, w in enumerate(taps):
            b = (int(off) + c) % dft_size
            k = b if b < nbins else dft_size - b
            wfilt[k, col0 + j] += scale * float(w)

    dft_dev = jnp.asarray(dftmat, dtype=matmul_dtype)
    wfilt_dev = jnp.asarray(wfilt, dtype=matmul_dtype)

    # ---- tile the frame axis -------------------------------------------------
    in_item = jnp.dtype(matmul_dtype).itemsize
    out_item = jnp.dtype(out_dtype).itemsize
    const_bytes = 2 * (L_PAD * 2 * NBINS_PAD + NBINS_PAD * F_PAD) * in_item
    per_frame_bytes = (2 * L_PAD * in_item + 2 * F_PAD * out_item
                       + (2 * NBINS_PAD + NBINS_PAD + 2 * F_PAD) * 4)
    num_cores = _num_tensorcores()
    if frame_tile is None:
        frame_tile = _choose_frame_tile(num_frames, per_frame_bytes,
                                        const_bytes, num_cores)
    frame_tile = _round_up(int(frame_tile), 8)
    nf_pad = _round_up(num_frames, frame_tile)
    frames = jnp.pad(frames, ((0, nf_pad - num_frames),
                              (0, L_PAD - frame_length)))
    grid = (nf_pad // frame_tile,)

    footprint = const_bytes + frame_tile * per_frame_bytes
    vmem_limit = int(min(48 << 20, max(8 << 20, int(footprint * 1.5) + (2 << 20))))

    apply_log_in_kernel = bool(use_log and pad_output)
    kernel = functools.partial(
        _stft_kernel, frame_length=frame_length, nbins_pad=NBINS_PAD,
        use_power=use_power, apply_log=apply_log_in_kernel,
        include_energy=include_energy, eps=float(eps))

    flops = nf_pad * (2 * L_PAD * 2 * NBINS_PAD + 2 * NBINS_PAD * F_PAD
                      + 6 * NBINS_PAD + 2 * L_PAD + 2 * F_PAD)
    transcendentals = nf_pad * ((0 if use_power else NBINS_PAD)
                                + (F_PAD if apply_log_in_kernel else 0) + 1)
    bytes_accessed = (nf_pad * L_PAD * in_item + nf_pad * F_PAD * out_item
                      + (L_PAD * 2 * NBINS_PAD + NBINS_PAD * F_PAD) * in_item)

    out = pl.pallas_call(
        kernel,
        out_shape=jax.ShapeDtypeStruct((nf_pad, F_PAD), out_dtype),
        grid=grid,
        in_specs=[
            pl.BlockSpec((frame_tile, L_PAD), lambda i: (i, 0)),
            pl.BlockSpec((L_PAD, 2 * NBINS_PAD), lambda i: (0, 0)),
            pl.BlockSpec((NBINS_PAD, F_PAD), lambda i: (0, 0)),
        ],
        out_specs=pl.BlockSpec((frame_tile, F_PAD), lambda i: (i, 0)),
        compiler_params=pltpu.CompilerParams(
            dimension_semantics=("parallel",),
            vmem_limit_bytes=vmem_limit),
        cost_estimate=pl.CostEstimate(
            flops=int(flops), transcendentals=int(transcendentals),
            bytes_accessed=int(bytes_accessed)),
    )(frames, dft_dev, wfilt_dev)

    if pad_output:
        return out                         # (nf_pad, F_PAD), log already applied
    y = out[:num_frames, :ncoeff]
    if use_log:
        # clamp+log fused into the (cheap) slice pass: runs over ncoeff real
        # columns instead of F_PAD padded lanes.
        y = jnp.log(jnp.maximum(y.astype(jnp.float32), float(eps)))
    return y.astype(out_dtype)


def _reference(signal, offsets, filters, frame_length, frame_shift, window,
               dft_size, centered, use_log, use_power, include_energy,
               kaldi_shift, is_real, eps=LOG_FLOOR_VALUE):
    """Float64 numpy port of pytorch_stft_frame_computer (no spectrum wrap)."""
    sig = np.asarray(signal, np.float64)
    sig_len = sig.shape[0]
    if not centered:
        pad_left = 0
    elif kaldi_shift:
        pad_left = frame_length // 2 - frame_shift // 2
    else:
        pad_left = (frame_length + 1) // 2 - 1
    num_frames = max(0, (sig_len + frame_shift // 2) // frame_shift)
    total_len = (num_frames - 1) * frame_shift - pad_left + frame_length
    pad_right = max(0, total_len - sig_len)
    padded = np.concatenate(
        [sig[:pad_left][::-1], sig, sig[sig_len - pad_right:][::-1]])
    idx = (np.arange(num_frames)[:, None] * frame_shift
           + np.arange(frame_length)[None, :])
    frames = padded[idx]
    ys = []
    if include_energy:
        energy = np.linalg.norm(frames, 2, axis=1) / math.sqrt(frame_length)
        if use_power:
            energy = energy ** 2
        ys.append(energy)
    win = np.ones(frame_length) if window is None else np.asarray(window, np.float64)
    spect = np.fft.rfft(frames * win, dft_size, axis=1)
    for off, filt in zip(offsets, filters):
        seg = spect[:, off:off + len(filt)] * np.asarray(filt)
        if use_power:
            v = np.sum(np.abs(seg) ** 2, axis=1)
        else:
            v = np.sum(np.abs(seg), axis=1)
        if is_real:
            v = 2.0 * v
        ys.append(v)
    y = np.stack(ys, axis=1)
    if use_log:
        y = np.log(np.maximum(y, eps))
    return y.astype(np.float32)


if __name__ == "__main__":
    key = jax.random.PRNGKey(0)

    # small, module-consistent shapes
    sig_len = 1600
    frame_length = 64
    frame_shift = 32
    dft_size = 64          # nbins = 33
    num_filts = 10

    signal = jax.random.normal(key, (sig_len,), dtype=jnp.float32)

    # periodic Hann window
    n = np.arange(frame_length)
    window = (0.5 - 0.5 * np.cos(2.0 * np.pi * n / frame_length)).astype(np.float32)

    # deterministic complex triangular filters, 5 bins wide, inside the half spectrum
    width = 5
    tri = np.array([0.5, 1.0, 1.5, 1.0, 0.5], np.float32)
    offsets, filters = [], []
    for j in range(num_filts):
        offsets.append(1 + 3 * j)
        phase = np.exp(1j * 2.0 * np.pi * (np.arange(width) + j) / 7.0)
        filters.append((tri * (1.0 + 0.1 * j) * phase).astype(np.complex64))

    kwargs = dict(frame_length=frame_length, frame_shift=frame_shift,
                  window=window, dft_size=dft_size, centered=True,
                  use_log=True, use_power=False, include_energy=True,
                  kaldi_shift=False, is_real=True)

    ref = _reference(np.asarray(signal), offsets, filters, **kwargs)

    # 1) full-f32 matmul path: numerically equivalent to the previous version.
    out_f32 = stft_frame_computer(signal, offsets=offsets, filters=filters,
                                  matmul_dtype=jnp.float32, **kwargs)
    out_f32 = jax.block_until_ready(out_f32)
    assert out_f32.shape == ref.shape, (out_f32.shape, ref.shape)
    assert np.allclose(np.asarray(out_f32), ref, atol=2e-3, rtol=2e-3), (
        float(np.max(np.abs(np.asarray(out_f32) - ref))))

    # 2) default bf16-operand path (f32 accumulation): validate in the linear
    #    (pre-log) domain with a bf16-appropriate tolerance.
    out_bf16 = stft_frame_computer(signal, offsets=offsets, filters=filters,
                                   **kwargs)
    out_bf16 = jax.block_until_ready(out_bf16)
    assert out_bf16.shape == ref.shape, (out_bf16.shape, ref.shape)
    lin_out = np.exp(np.asarray(out_bf16, np.float64))
    lin_ref = np.exp(ref.astype(np.float64))
    assert np.allclose(lin_out, lin_ref, rtol=6e-2, atol=1.0), (
        float(np.max(np.abs(lin_out - lin_ref))))

    print("KERNEL_OK")
</pallas_src>

<mosaic_0001>
module attributes {stable_mosaic.version = 11 : i64} {
  func.func @_stft_kernel(%arg0: i32, %arg1: memref<56x128xf32, #tpu.memory_space<vmem>>, %arg2: memref<128x256xf32, #tpu.memory_space<vmem>>, %arg3: memref<128x128xf32, #tpu.memory_space<vmem>>, %arg4: memref<56x128xf32, #tpu.memory_space<vmem>>) attributes {dimension_semantics = [#tpu.dimension_semantics<parallel>], iteration_bounds = array<i64: 1>, scalar_prefetch = 0 : i64, scratch_operands = 0 : i64, tpu.core_type = #tpu.core_type<tc>, window_params = [{transform_indices = @transform_0, window_bounds = array<i64: 56, 128>}, {pipeline_mode = #tpu.pipeline_mode<synchronous>, transform_indices = @transform_1, window_bounds = array<i64: 128, 256>}, {pipeline_mode = #tpu.pipeline_mode<synchronous>, transform_indices = @transform_2, window_bounds = array<i64: 128, 128>}, {transform_indices = @transform_3, window_bounds = array<i64: 56, 128>}]} {
    %c0 = arith.constant 0 : index
    %c0_0 = arith.constant 0 : index
    %0 = vector.load %arg1[%c0, %c0_0] : memref<56x128xf32, #tpu.memory_space<vmem>>, vector<56x128xf32>
    %c0_1 = arith.constant 0 : index
    %c0_2 = arith.constant 0 : index
    %1 = vector.load %arg2[%c0_1, %c0_2] : memref<128x256xf32, #tpu.memory_space<vmem>>, vector<128x256xf32>
    %cst = arith.constant dense<0.000000e+00> : vector<56x256xf32>
    %2 = tpu.matmul %0, %1, %cst {dimension_numbers = #tpu.dot_dimension_numbers<[1], [0], [0], [1], [0, 0, 1, 1], [], []>} : vector<56x128xf32>, vector<128x256xf32>, vector<56x256xf32> -> vector<56x256xf32>
    %3 = vector.extract_strided_slice %2 {offsets = [0, 0], sizes = [56, 128], strides = [1, 1]} : vector<56x256xf32> to vector<56x128xf32>
    %4 = vector.extract_strided_slice %2 {offsets = [0, 128], sizes = [56, 128], strides = [1, 1]} : vector<56x256xf32> to vector<56x128xf32>
    %5 = arith.mulf %3, %3 : vector<56x128xf32>
    %6 = arith.mulf %4, %4 : vector<56x128xf32>
    %7 = arith.addf %5, %6 : vector<56x128xf32>
    %8 = math.sqrt %7 : vector<56x128xf32>
    %c0_3 = arith.constant 0 : index
    %c0_4 = arith.constant 0 : index
    %9 = vector.load %arg3[%c0_3, %c0_4] : memref<128x128xf32, #tpu.memory_space<vmem>>, vector<128x128xf32>
    %cst_5 = arith.constant dense<0.000000e+00> : vector<56x128xf32>
    %10 = tpu.matmul %8, %9, %cst_5 {dimension_numbers = #tpu.dot_dimension_numbers<[1], [0], [0], [1], [0, 0, 1, 1], [], []>} : vector<56x128xf32>, vector<128x128xf32>, vector<56x128xf32> -> vector<56x128xf32>
    %11 = arith.mulf %0, %0 : vector<56x128xf32>
    %cst_6 = arith.constant dense<0.000000e+00> : vector<56xf32>
    %12 = vector.multi_reduction <add>, %11, %cst_6 [1] : vector<56x128xf32> to vector<56xf32>
    %13 = vector.shape_cast %12 : vector<56xf32> to vector<56x1xf32>
    %cst_7 = arith.constant 1.562500e-02 : f32
    %14 = vector.broadcast %cst_7 : f32 to vector<56x1xf32>
    %15 = arith.mulf %13, %14 : vector<56x1xf32>
    %16 = math.sqrt %15 : vector<56x1xf32>
    %17 = tpu.iota {dimensions = array<i32: 1>} : vector<1x128xi32>
    %c0_i32 = arith.constant 0 : i32
    %18 = vector.broadcast %c0_i32 : i32 to vector<1x128xi32>
    %19 = arith.cmpi eq, %17, %18 : vector<1x128xi32>
    %20 = arith.extui %19 : vector<1x128xi1> to vector<1x128xi32>
    %21 = arith.sitofp %20 : vector<1x128xi32> to vector<1x128xf32>
    %22 = vector.broadcast %16 : vector<56x1xf32> to vector<56x128xf32>
    %23 = vector.broadcast %21 : vector<1x128xf32> to vector<56x128xf32>
    %24 = arith.mulf %22, %23 : vector<56x128xf32>
    %25 = arith.addf %10, %24 : vector<56x128xf32>
    %c0_8 = arith.constant 0 : index
    %c0_9 = arith.constant 0 : index
    %26 = vector.load %arg4[%c0_8, %c0_9] : memref<56x128xf32, #tpu.memory_space<vmem>>, vector<56x128xf32>
    tpu.vector_store %arg4[%c0_8, %c0_9], %25 {strides = array<i32>} : memref<56x128xf32, #tpu.memory_space<vmem>>, vector<56x128xf32>,
    return
  }
  func.func @transform_0(%arg0: i32) -> (i32, i32) {
    %c0_i32 = arith.constant 0 : i32
    %c0_i32_0 = arith.constant 0 : i32
    return %arg0, %c0_i32 : i32, i32
  }
  func.func @transform_1(%arg0: i32) -> (i32, i32) {
    %c0_i32 = arith.constant 0 : i32
    %c0_i32_0 = arith.constant 0 : i32
    %c0_i32_1 = arith.constant 0 : i32
    return %c0_i32, %c0_i32_0 : i32, i32
  }
  func.func @transform_2(%arg0: i32) -> (i32, i32) {
    %c0_i32 = arith.constant 0 : i32
    %c0_i32_0 = arith.constant 0 : i32
    %c0_i32_1 = arith.constant 0 : i32
    return %c0_i32, %c0_i32_0 : i32, i32
  }
  func.func @transform_3(%arg0: i32) -> (i32, i32) {
    %c0_i32 = arith.constant 0 : i32
    %c0_i32_0 = arith.constant 0 : i32
    return %arg0, %c0_i32 : i32, i32
  }
}

</mosaic_0001>

<bundles_post_ra>
// kernel: tpu_custom_call.1
= control target key start
LH: loop header
LB: loop body
LE: loop exit
PB: predicated region body
PF: predicated region fallthrough
CT: control target
= control target key end

     0   :  { %8 = vsyncpa [#allocation3], 0  ;;  %s919_s0 = inlined_call_operand.hbm [shape: f32[56,128], index: 0, kind: input, shape index: {}]   ;;  %s920_s1 = inlined_call_operand.hbm [shape: f32[128,256], index: 1, kind: input, shape index: {}]   ;;  %s921_s2 = inlined_call_operand.hbm [shape: f32[128,128], index: 2, kind: input, shape index: {}]   ;;  %s922_s3 = inlined_call_operand.hbm [shape: f32[56,128], index: 3, kind: output, shape index: {}]  }
   0x1   :  { %9 = vsyncpa [#allocation6], 0 }
   0x2   :  { %10 = vsyncpa [#allocation4], 0  ;;  %s768_s12 = smov [#allocation5]   ;;  %s674_s16 = scalar_lea.hbm %s920_s1, 4096 }
   0x3   :  { %s28_s13 = sshll.u32 %s768_s12, 4  ;;  %p675_p0 = scmp.ne.s32.totalorder %s920_s1, %s674_s16  ;;  %s29_s13 = int_to_ptr.vmem [resolvable:$true] %s28_s13 }
   0x4   :  { %p678_p1 = scmp.lt.u32.totalorder %s674_s16, %s920_s1 }
   0x6   :  { %p680_p2 = pnand %p678_p1, %p675_p0 }
   0x8   :  { %683 = shalt.err (!%p680_p2)
}
   0x9   :  { %s684_s21 = scalar_lea.vmem %s29_s13, 4096  ;;  %p689_p4 = scmp.lt.s32.totalorder %s29_s13, %s29_s13 }
   0xa   :  { %p685_p3 = scmp.ne.s32.totalorder %s29_s13, %s684_s21  ;;  %p690_p5 = scmp.lt.s32.totalorder %s684_s21, %s684_s21 }
   0xc   :  { %p691_p6 = por %p690_p5, %p689_p4 }
   0xe   :  { %p692_p7 = pnand %p691_p6, %p685_p3 }
  0x10   :  { %695 = shalt.err (!%p692_p7)
}
  0x11   :  { %s769_s22 = smov 256   ;;  %s770_s23 = smov 16  }
  0x12   :  { %34 = dma.hbm_to_vmem [thread:$0]  %s920_s1, 4096, %s29_s13, [#allocation6], %s769_s22, %s769_s22, %s770_s23  }
  0x13   :  { %s771_s26 = smov [#allocation2]   ;;  %s696_s30 = scalar_lea.hbm %s919_s0, 896 }
  0x14   :  { %s16_s27 = sshll.u32 %s771_s26, 4  ;;  %p697_p8 = scmp.ne.s32.totalorder %s919_s0, %s696_s30  ;;  %s17_s27 = int_to_ptr.vmem [resolvable:$true] %s16_s27 }
  0x15   :  { %p700_p9 = scmp.lt.u32.totalorder %s696_s30, %s919_s0 }
  0x17   :  { %p702_p10 = pnand %p700_p9, %p697_p8 }
  0x19   :  { %705 = shalt.err (!%p702_p10)
}
  0x1a   :  { %s706_s8 = scalar_lea.vmem %s17_s27, 896  ;;  %p711_p12 = scmp.lt.s32.totalorder %s17_s27, %s17_s27 }
  0x1b   :  { %p707_p11 = scmp.ne.s32.totalorder %s17_s27, %s706_s8  ;;  %p712_p13 = scmp.lt.s32.totalorder %s706_s8, %s706_s8 }
  0x1d   :  { %p713_p0 = por %p712_p13, %p711_p12 }
  0x1f   :  { %p714_p1 = pnand %p713_p0, %p707_p11 }
  0x21   :  { %717 = shalt.err (!%p714_p1)
}
  0x22   :  { %s772_s1 = smov 128   ;;  %s773_s9 = smov 8  }
  0x23   :  { %22 = dma.hbm_to_vmem [thread:$0]  %s919_s0, 896, %s17_s27, [#allocation3], %s772_s1, %s772_s1, %s773_s9  }
  0x24   :  { %s774_s12 = smov [#allocation7]   ;;  %s718_s16 = scalar_lea.hbm %s921_s2, 2048 }
  0x25   :  { %s40_s13 = sshll.u32 %s774_s12, 4  ;;  %p719_p2 = scmp.ne.s32.totalorder %s921_s2, %s718_s16  ;;  %s41_s13 = int_to_ptr.vmem [resolvable:$true] %s40_s13 }
  0x26   :  { %p722_p3 = scmp.lt.u32.totalorder %s718_s16, %s921_s2 }
  0x28   :  { %p724_p4 = pnand %p722_p3, %p719_p2 }
  0x2a   :  { %727 = shalt.err (!%p724_p4)
}
  0x2b   :  { %s728_s21 = scalar_lea.vmem %s41_s13, 2048  ;;  %p733_p6 = scmp.lt.s32.totalorder %s41_s13, %s41_s13 }
  0x2c   :  { %p729_p5 = scmp.ne.s32.totalorder %s41_s13, %s728_s21  ;;  %p734_p7 = scmp.lt.s32.totalorder %s728_s21, %s728_s21 }
  0x2e   :  { %p735_p8 = por %p734_p7, %p733_p6 }
  0x30   :  { %p736_p9 = pnand %p735_p8, %p729_p5 }
  0x32   :  { %739 = shalt.err (!%p736_p9)
}
  0x33   :  { %46 = dma.hbm_to_vmem [thread:$0]  %s921_s2, 2048, %s41_s13, [#allocation6], %s772_s1, %s772_s1, %s773_s9  }
  0x34   :  { %762 = dma.done.wait [#allocation3], 896  }
  0x35   :  { %763 = vsyncadd [#allocation3], 4294966400 }
  0x36   :  { %764 = dma.done.wait [#allocation6], 6144  }
  0x37   :  { %765 = vsyncadd [#allocation6], 4294961152  ;;  %v775_v0 = vmov 0.0   ;;  %v776_v1 = vmov 0.0|0.0   ;;  %v64_v2 = vld [vmem:[#allocation5 + $0x8] sm:$0xff]  ;;  %v66_v3 = vld [vmem:[#allocation5 + $0x18] sm:$0xff] }
  0x38   :  { %159 = vmatprep.mubr.f32.mxu0 %v775_v0  ;;  %611 = vmatprep.subr.bf16.mxu1 %v776_v1  ;;  %v63_v4 = vld [vmem:[#allocation5] sm:$0xff]  ;;  %v579_v5 = vpack.c.bf16 %v66_v3, %v64_v2  ;;  %v65_v6 = vld [vmem:[#allocation5 + $0x10] sm:$0xff]  ;;  %v68_v7 = vld [vmem:[#allocation5 + $0x28] sm:$0xff]  ;;  %vm777_vm0 = vmmov 0   ;;  %s778_s2 = smov [#allocation8]  }
  0x39   :  { %v70_v8 = vld [vmem:[#allocation5 + $0x38] sm:$0xff]  ;;  %v581_v9 = vpack.c.bf16 %v65_v6, %v63_v4  ;;  %v67_v11 = vld [vmem:[#allocation5 + $0x20] sm:$0xff]  ;;  %v69_v12 = vld [vmem:[#allocation5 + $0x30] sm:$0xff]  ;;  %558 = vmatprep.mubr.msk.f32.mxu1 %vm777_vm0, %v775_v0  ;;  %s489_s23 = sshll.u32 %s778_s2, 4  ;;  %s490_s23 = int_to_ptr.vmem [resolvable:$true] %s489_s23 }
  0x3a   :  { %v583_v10 = vpack.c.bf16 %v70_v8, %v68_v7  ;;  %v72_v13 = vld [vmem:[#allocation5 + $0x48] sm:$0xff]  ;;  %580 = vmatprep.subr.bf16.mxu0 %v579_v5  ;;  %v74_v14 = vld [vmem:[#allocation5 + $0x58] sm:$0xff]  ;;  %v585_v15 = vpack.c.bf16 %v69_v12, %v67_v11  ;;  %v71_v17 = vld [vmem:[#allocation5 + $0x40] sm:$0xff]  ;;  %s740_s24 = scalar_lea.vmem %s490_s23, 896  ;;  %p745_p11 = scmp.lt.s32.totalorder %s490_s23, %s490_s23 }
  0x3b   :  { %582 = vmatpush1.bf16.msra.mxu0 %v581_v9  ;;  %v587_v16 = vpack.c.bf16 %v74_v14, %v72_v13  ;;  %v73_v18 = vld [vmem:[#allocation5 + $0x50] sm:$0xff]  ;;  %v76_v19 = vld [vmem:[#allocation5 + $0x68] sm:$0xff]  ;;  %v78_v20 = vld [vmem:[#allocation5 + $0x78] sm:$0xff]  ;;  %p741_p10 = scmp.ne.s32.totalorder %s490_s23, %s740_s24  ;;  %p746_p12 = scmp.lt.s32.totalorder %s740_s24, %s740_s24 }
  0x3c   :  { %584 = vmatprep.subr.bf16.mxu0 %v583_v10  ;;  %v589_v21 = vpack.c.bf16 %v73_v18, %v71_v17  ;;  %v591_v22 = vpack.c.bf16 %v78_v20, %v76_v19  ;;  %v75_v23 = vld [vmem:[#allocation5 + $0x60] sm:$0xff]  ;;  %v77_v24 = vld [vmem:[#allocation5 + $0x70] sm:$0xff]  ;;  %v80_v25 = vld [vmem:[#allocation5 + $0x88] sm:$0xff] }
  0x3d   :  { %v82_v26 = vld [vmem:[#allocation5 + $0x98] sm:$0xff]  ;;  %v593_v27 = vpack.c.bf16 %v77_v24, %v75_v23  ;;  %v79_v28 = vld [vmem:[#allocation5 + $0x80] sm:$0xff]  ;;  %v81_v29 = vld [vmem:[#allocation5 + $0x90] sm:$0xff]  ;;  %p747_p13 = por %p746_p12, %p745_p11 }
  0x3e   :  { %v595_v30 = vpack.c.bf16 %v82_v26, %v80_v25  ;;  %v272_v31 = vld [vmem:[#allocation7] sm:$0xff]  ;;  %v273_v32 = vld [vmem:[#allocation7 + $0x8] sm:$0xff]  ;;  %v274_v33 = vld [vmem:[#allocation7 + $0x10] sm:$0xff]  ;;  %v597_v38 = vpack.c.bf16 %v81_v29, %v79_v28 }
  0x3f   :  { %586 = vmatpush1.bf16.msra.mxu0 %v585_v15  ;;  %v84_v34 = vld [vmem:[#allocation5 + $0xa8] sm:$0xff]  ;;  %v86_v35 = vld [vmem:[#allocation5 + $0xb8] sm:$0xff]  ;;  %v612_v36 = vpack.c.bf16 %v273_v32, %v272_v31  ;;  %v83_v39 = vld [vmem:[#allocation5 + $0xa0] sm:$0xff]  ;;  %p748_p0 = pnand %p747_p13, %p741_p10 }
  0x40   :  { %588 = vmatprep.subr.bf16.mxu0 %v587_v16  ;;  %v275_v37 = vld [vmem:[#allocation7 + $0x18] sm:$0xff]  ;;  %v599_v41 = vpack.c.bf16 %v86_v35, %v84_v34  ;;  %v85_v42 = vld [vmem:[#allocation5 + $0xb0] sm:$0xff]  ;;  %v276_v43 = vld [vmem:[#allocation7 + $0x20] sm:$0xff] }
  0x41   :  { %613 = vmatpush3.bf16.msra.mxu1 %v612_v36  ;;  %v615_v40 = vpack.c.bf16 %v275_v37, %v274_v33  ;;  %v277_v44 = vld [vmem:[#allocation7 + $0x28] sm:$0xff]  ;;  %v90_v46 = vld [vmem:[#allocation5 + $0xd8] sm:$0xff]  ;;  %v601_v47 = vpack.c.bf16 %v85_v42, %v83_v39  ;;  %v87_v50 = vld [vmem:[#allocation5 + $0xc0] sm:$0xff] }
  0x42   :  { %614 = vmatprep.subr.bf16.mxu1 %v776_v1  ;;  %v88_v45 = vld [vmem:[#allocation5 + $0xc8] sm:$0xff]  ;;  %v618_v48 = vpack.c.bf16 %v277_v44, %v276_v43  ;;  %v89_v51 = vld [vmem:[#allocation5 + $0xd0] sm:$0xff]  ;;  %v94_v53 = vld [vmem:[#allocation5 + $0xf8] sm:$0xff] }
  0x43   :  { %590 = vmatpush1.bf16.msra.mxu0 %v589_v21  ;;  %v603_v49 = vpack.c.bf16 %v90_v46, %v88_v45  ;;  %v92_v52 = vld [vmem:[#allocation5 + $0xe8] sm:$0xff]  ;;  %v605_v54 = vpack.c.bf16 %v89_v51, %v87_v50  ;;  %v91_v56 = vld [vmem:[#allocation5 + $0xe0] sm:$0xff]  ;;  %v93_v57 = vld [vmem:[#allocation5 + $0xf0] sm:$0xff] }
  0x44   :  { %592 = vmatprep.subr.bf16.mxu0 %v591_v22  ;;  %v607_v55 = vpack.c.bf16 %v94_v53, %v92_v52  ;;  %v609_v58 = vpack.c.bf16 %v93_v57, %v91_v56  ;;  %v56_v59 = vld [vmem:[#allocation2] sm:$0xff]  ;;  %v57_v60 = vld [vmem:[#allocation2 + $0x8] sm:$0xff]  ;;  %v58_v61 = vld [vmem:[#allocation2 + $0x10] sm:$0xff] }
  0x45   :  { %616 = vmatpush3.bf16.msra.mxu1 %v615_v40  ;;  %v59_v62 = vld [vmem:[#allocation2 + $0x18] sm:$0xff]  ;;  %v60_v63 = vld [vmem:[#allocation2 + $0x20] sm:$0xff]  ;;  %v61_v2 = vld [vmem:[#allocation2 + $0x28] sm:$0xff]  ;;  %v288_v19 = vmul.f32 %v56_v59, %v56_v59  ;;  %v290_v20 = vmul.f32 %v58_v61, %v58_v61  ;;  %v289_v21 = vmul.f32 %v57_v60, %v57_v60 }
  0x46   :  { %617 = vmatprep.subr.bf16.mxu1 %v776_v1  ;;  %v62_v3 = vld [vmem:[#allocation2 + $0x30] sm:$0xff]  ;;  %v278_v4 = vld [vmem:[#allocation7 + $0x30] sm:$0xff]  ;;  %v280_v7 = vld [vmem:[#allocation7 + $0x40] sm:$0xff]  ;;  %v291_v22 = vmul.f32 %v59_v62, %v59_v62  ;;  %v292_v23 = vmul.f32 %v60_v63, %v60_v63  ;;  %v293_v24 = vmul.f32 %v61_v2, %v61_v2 }
  0x47   :  { %594 = vmatpush1.bf16.msra.mxu0 %v593_v27  ;;  %v279_v5 = vld [vmem:[#allocation7 + $0x38] sm:$0xff]  ;;  %v281_v8 = vld [vmem:[#allocation7 + $0x48] sm:$0xff]  ;;  %v282_v10 = vld [vmem:[#allocation7 + $0x50] sm:$0xff]  ;;  %295 = vadd.xlane.f32.xlu0 %v288_v19 }
  0x48   :  { %596 = vmatprep.subr.bf16.mxu0 %v595_v30  ;;  %v621_v6 = vpack.c.bf16 %v279_v5, %v278_v4  ;;  %v624_v9 = vpack.c.bf16 %v281_v8, %v280_v7  ;;  %v283_v11 = vld [vmem:[#allocation7 + $0x58] sm:$0xff]  ;;  %v284_v13 = vld [vmem:[#allocation7 + $0x60] sm:$0xff]  ;;  %v285_v14 = vld [vmem:[#allocation7 + $0x68] sm:$0xff]  ;;  %299 = vadd.xlane.f32.xlu1 %v290_v20 }
  0x49   :  { %619 = vmatpush3.bf16.msra.mxu1 %v618_v48  ;;  %v627_v12 = vpack.c.bf16 %v283_v11, %v282_v10  ;;  %v630_v15 = vpack.c.bf16 %v285_v14, %v284_v13  ;;  %v286_v16 = vld [vmem:[#allocation7 + $0x70] sm:$0xff]  ;;  %v287_v17 = vld [vmem:[#allocation7 + $0x78] sm:$0xff] }
  0x4a   :  { %620 = vmatprep.subr.bf16.mxu1 %v776_v1  ;;  %v633_v18 = vpack.c.bf16 %v287_v17, %v286_v16 }
  0x4b   :  { %598 = vmatpush1.bf16.msra.mxu0 %v597_v38  ;;  %297 = vadd.xlane.f32.xlu0 %v289_v21 }
  0x4c   :  { %600 = vmatprep.subr.bf16.mxu0 %v599_v41  ;;  %301 = vadd.xlane.f32.xlu1 %v291_v22 }
  0x4d   :  { %622 = vmatpush3.bf16.msra.mxu1 %v621_v6 }
  0x4e   :  { %623 = vmatprep.subr.bf16.mxu1 %v776_v1 }
  0x4f   :  { %602 = vmatpush1.bf16.msra.mxu0 %v601_v47  ;;  %303 = vadd.xlane.f32.xlu0 %v292_v23 }
  0x50   :  { %604 = vmatprep.subr.bf16.mxu0 %v603_v49  ;;  %305 = vadd.xlane.f32.xlu1 %v293_v24 }
  0x51   :  { %625 = vmatpush3.bf16.msra.mxu1 %v624_v9 }
  0x52   :  { %626 = vmatprep.subr.bf16.mxu1 %v776_v1 }
  0x53   :  { %606 = vmatpush1.bf16.msra.mxu0 %v605_v54 }
  0x54   :  { %608 = vmatprep.subr.bf16.mxu0 %v607_v55 }
  0x55   :  { %628 = vmatpush3.bf16.msra.mxu1 %v627_v12 }
  0x56   :  { %629 = vmatprep.subr.bf16.mxu1 %v776_v1 }
  0x57   :  { %610 = vmatpush1.bf16.msra.mxu0 %v609_v58 }
  0x59   :  { %631 = vmatpush3.bf16.msra.mxu1 %v630_v15 }
  0x5a   :  { %160 = vmatmul.mubr.f32.vlgmr.msra.gmra.mrb[0].mxu0 %v56_v59  ;;  %632 = vmatprep.subr.bf16.mxu1 %v776_v1  ;;  %v294_v1 = vmul.f32 %v62_v3, %v62_v3 }
  0x5b   :  { %165 = vmatprep.mubr.f32.mxu0 %v775_v0 }
  0x5c   :  { %307 = vadd.xlane.f32.xlu0 %v294_v1 }
  0x5d   :  { %634 = vmatpush3.bf16.msra.mxu1 %v633_v18 }
  0x5e   :  { %166 = vmatmul.mubr.f32.gmra.mrb[2].mxu0 %v57_v60 }
  0x5f   :  { %171 = vmatprep.mubr.f32.mxu0 %v775_v0 }
  0x62   :  { %172 = vmatmul.mubr.f32.gmra.mrb[4].mxu0 %v58_v61 }
  0x63   :  { %177 = vmatprep.mubr.f32.mxu0 %v775_v0 }
  0x66   :  { %178 = vmatmul.mubr.f32.gmra.mrb[6].mxu0 %v59_v62 }
  0x67   :  { %183 = vmatprep.mubr.f32.mxu0 %v775_v0 }
  0x6a   :  { %184 = vmatmul.mubr.f32.gmra.mrb[8].mxu0 %v60_v63 }
  0x6b   :  { %189 = vmatprep.mubr.f32.mxu0 %v775_v0 }
  0x6e   :  { %190 = vmatmul.mubr.f32.gmra.mrb[10].mxu0 %v61_v2 }
  0x6f   :  { %195 = vmatprep.mubr.f32.mxu0 %v775_v0 }
  0x72   :  { %196 = vmatmul.mubr.f32.gmra.mrb[12].mxu0 %v62_v3 }
 0x12d   :  { %v161_v25 = vpop.f32.mrb[0].mxu0 }
 0x12e   :  { %v202_v26 = vmul.f32 %v161_v25, %v161_v25  ;;  %v163_v27 = vpop.f32.mrb[1].mxu0 }
 0x12f   :  { %v209_v28 = vmul.f32 %v163_v27, %v163_v27 }
 0x131   :  { %v216_v29 = vadd.f32 %v209_v28, %v202_v26  ;;  %v167_v30 = vpop.f32.mrb[2].mxu0 }
 0x132   :  { %v203_v31 = vmul.f32 %v167_v30, %v167_v30  ;;  %v169_v32 = vpop.f32.mrb[3].mxu0 }
 0x133   :  { %v210_v33 = vmul.f32 %v169_v32, %v169_v32  ;;  %646 = vrsqrt.f32 %v216_v29  ;;  %vm225_vm1 = vcmp.eq.f32.partialorder %v216_v29, inf  ;;  %v228_v51 = vand.u32 2147483648, %v216_v29  ;;  %v296_v32 = vpop.xlane.xlu0 %295 }
 0x134   :  { %vm227_vm2 = vcmp.eq.f32.partialorder %v216_v29, 0.0 }
 0x135   :  { %v217_v34 = vadd.f32 %v210_v33, %v203_v31  ;;  %v173_v35 = vpop.f32.mrb[4].mxu0  ;;  %v309_v33 = vmul.f32 0.015625, %v296_v32 }
 0x136   :  { %v204_v36 = vmul.f32 %v173_v35, %v173_v35  ;;  %v175_v37 = vpop.f32.mrb[5].mxu0 }
 0x137   :  { %v211_v38 = vmul.f32 %v175_v37, %v175_v37  ;;  %648 = vrsqrt.f32 %v217_v34  ;;  %vm232_vm3 = vcmp.eq.f32.partialorder %v217_v34, inf  ;;  %v235_v61 = vand.u32 2147483648, %v217_v34 }
 0x138   :  { %vm234_vm4 = vcmp.eq.f32.partialorder %v217_v34, 0.0  ;;  %vm318_vm15 = vcmp.eq.f32.partialorder %v309_v33, inf }
 0x139   :  { %v218_v39 = vadd.f32 %v211_v38, %v204_v36  ;;  %v179_v40 = vpop.f32.mrb[6].mxu0  ;;  %v300_v36 = vpop.xlane.xlu1 %299 }
 0x13a   :  { %v205_v41 = vmul.f32 %v179_v40, %v179_v40  ;;  %v181_v42 = vpop.f32.mrb[7].mxu0  ;;  %v311_v37 = vmul.f32 0.015625, %v300_v36 }
 0x13b   :  { %v212_v43 = vmul.f32 %v181_v42, %v181_v42  ;;  %650 = vrsqrt.f32 %v218_v39  ;;  %vm239_vm5 = vcmp.eq.f32.partialorder %v218_v39, inf  ;;  %v242_v9 = vand.u32 2147483648, %v218_v39 }
 0x13c   :  { %vm241_vm6 = vcmp.eq.f32.partialorder %v218_v39, 0.0 }
 0x13d   :  { %v647_v44 = vpop.eup %646  ;;  %v219_v45 = vadd.f32 %v212_v43, %v205_v41  ;;  %v185_v46 = vpop.f32.mrb[8].mxu0 }
 0x13e   :  { %v206_v47 = vmul.f32 %v185_v46, %v185_v46  ;;  %v187_v48 = vpop.f32.mrb[9].mxu0  ;;  %v224_v49 = vmul.f32 %v647_v44, %v216_v29  ;;  %v302_v38 = vpop.xlane.xlu1 %301 }
 0x13f   :  { %v213_v50 = vmul.f32 %v187_v48, %v187_v48  ;;  %652 = vrsqrt.f32 %v219_v45  ;;  %vm246_vm7 = vcmp.eq.f32.partialorder %v219_v45, inf  ;;  %v249_v15 = vand.u32 2147483648, %v219_v45 }
 0x140   :  { %v226_v52 = vsel %vm225_vm1, %v216_v29, %v224_v49  ;;  %vm248_vm8 = vcmp.eq.f32.partialorder %v219_v45, 0.0  ;;  %v312_v41 = vmul.f32 0.015625, %v302_v38  ;;  %v321_v48 = vand.u32 2147483648, %v309_v33 }
 0x141   :  { %v649_v53 = vpop.eup %648  ;;  %v220_v54 = vadd.f32 %v213_v50, %v206_v47  ;;  %v191_v55 = vpop.f32.mrb[10].mxu0  ;;  %v229_v56 = vsel %vm227_vm2, %v228_v51, %v226_v52 }
 0x142   :  { %v207_v57 = vmul.f32 %v191_v55, %v191_v55  ;;  %v193_v58 = vpop.f32.mrb[11].mxu0  ;;  %559 = vmatmul.mubr.f32.vlgmr.msra.gmra.mrb[0].mxu1 %v229_v56  ;;  %v231_v59 = vmul.f32 %v649_v53, %v217_v34  ;;  %v306_v47 = vpop.xlane.xlu1 %305 }
 0x143   :  { %v214_v60 = vmul.f32 %v193_v58, %v193_v58  ;;  %561 = vmatprep.mubr.msk.f32.mxu1 %vm777_vm0, %v775_v0  ;;  %654 = vrsqrt.f32 %v220_v54  ;;  %vm253_vm9 = vcmp.eq.f32.partialorder %v220_v54, inf  ;;  %v256_v20 = vand.u32 2147483648, %v220_v54 }
 0x144   :  { %v233_v62 = vsel %vm232_vm3, %v217_v34, %v231_v59  ;;  %vm255_vm10 = vcmp.eq.f32.partialorder %v220_v54, 0.0  ;;  %v298_v34 = vpop.xlane.xlu0 %297  ;;  %v873_v51 = vmul.f32 0.015625, %v306_v47 }
 0x145   :  { %v651_v63 = vpop.eup %650  ;;  %v221_v2 = vadd.f32 %v214_v60, %v207_v57  ;;  %v197_v3 = vpop.f32.mrb[12].mxu0  ;;  %v236_v4 = vsel %vm234_vm4, %v235_v61, %v233_v62  ;;  %v310_v35 = vmul.f32 0.015625, %v298_v34  ;;  %vm332_vm4 = vcmp.eq.f32.partialorder %v311_v37, inf }
 0x146   :  { %v208_v5 = vmul.f32 %v197_v3, %v197_v3  ;;  %v199_v6 = vpop.f32.mrb[13].mxu0  ;;  %562 = vmatmul.mubr.f32.gmra.mrb[2].mxu1 %v236_v4  ;;  %v238_v7 = vmul.f32 %v651_v63, %v218_v39  ;;  %v335_v3 = vand.u32 2147483648, %v311_v37 }
 0x147   :  { %v215_v8 = vmul.f32 %v199_v6, %v199_v6  ;;  %564 = vmatprep.mubr.msk.f32.mxu1 %vm777_vm0, %v775_v0  ;;  %656 = vrsqrt.f32 %v221_v2  ;;  %vm260_vm11 = vcmp.eq.f32.partialorder %v221_v2, inf  ;;  %v263_v1 = vand.u32 2147483648, %v221_v2 }
 0x148   :  { %v240_v10 = vsel %vm239_vm5, %v218_v39, %v238_v7  ;;  %vm262_vm12 = vcmp.eq.f32.partialorder %v221_v2, 0.0  ;;  %v365_v39 = vlaneseq  ;;  %v304_v42 = vpop.xlane.xlu0 %303  ;;  %vm325_vm2 = vcmp.eq.f32.partialorder %v310_v35, inf }
 0x149   :  { %v653_v11 = vpop.eup %652  ;;  %v222_v12 = vadd.f32 %v215_v8, %v208_v5  ;;  %v243_v13 = vsel %vm241_vm6, %v242_v9, %v240_v10  ;;  %v870_v46 = vmul.f32 0.015625, %v304_v42  ;;  %v328_v56 = vand.u32 2147483648, %v310_v35 }
 0x14a   :  { %565 = vmatmul.mubr.f32.gmra.mrb[4].mxu1 %v243_v13  ;;  %v245_v14 = vmul.f32 %v653_v11, %v219_v45  ;;  %v366_v44 = vand.u32 127, %v365_v39  ;;  %vm327_vm3 = vcmp.eq.f32.partialorder %v310_v35, 0.0  ;;  %vm334_vm5 = vcmp.eq.f32.partialorder %v311_v37, 0.0 }
 0x14b   :  { %567 = vmatprep.mubr.msk.f32.mxu1 %vm777_vm0, %v775_v0  ;;  %658 = vrsqrt.f32 %v222_v12  ;;  %vm267_vm13 = vcmp.eq.f32.partialorder %v222_v12, inf  ;;  %v270_v29 = vand.u32 2147483648, %v222_v12  ;;  %vm269_vm14 = vcmp.eq.f32.partialorder %v222_v12, 0.0 }
 0x14c   :  { %v247_v16 = vsel %vm246_vm7, %v219_v45, %v245_v14  ;;  %660 = vrsqrt.f32 %v309_v33  ;;  %vm367_vm1 = vcmp.eq.s32.totalorder %v366_v44, 0  ;;  %v308_v53 = vpop.xlane.xlu0 %307  ;;  %vm339_vm6 = vcmp.eq.f32.partialorder %v312_v41, inf }
 0x14d   :  { %v655_v17 = vpop.eup %654  ;;  %v250_v18 = vsel %vm248_vm8, %v249_v15, %v247_v16  ;;  %662 = vrsqrt.f32 %v310_v35  ;;  %v876_v55 = vsel %vm367_vm1, 1.0, %v775_v0  ;;  %v879_v58 = vmul.f32 0.015625, %v308_v53 }
 0x14e   :  { %568 = vmatmul.mubr.f32.gmra.mrb[6].mxu1 %v250_v18  ;;  %v252_v19 = vmul.f32 %v655_v17, %v220_v54  ;;  %664 = vrsqrt.f32 %v311_v37  ;;  %v342_v10 = vand.u32 2147483648, %v312_v41  ;;  %vm341_vm7 = vcmp.eq.f32.partialorder %v312_v41, 0.0 }
 0x14f   :  { %570 = vmatprep.mubr.msk.f32.mxu1 %vm777_vm0, %v775_v0  ;;  %666 = vrsqrt.f32 %v312_v41  ;;  %vm346_vm8 = vcmp.eq.f32.partialorder %v870_v46, inf }
 0x150   :  { %v254_v21 = vsel %vm253_vm9, %v220_v54, %v252_v19  ;;  %668 = vrsqrt.f32 %v870_v46  ;;  %v349_v19 = vand.u32 2147483648, %v870_v46  ;;  %vm348_vm9 = vcmp.eq.f32.partialorder %v870_v46, 0.0 }
 0x151   :  { %v657_v22 = vpop.eup %656  ;;  %v257_v23 = vsel %vm255_vm10, %v256_v20, %v254_v21  ;;  %670 = vrsqrt.f32 %v873_v51  ;;  %vm353_vm10 = vcmp.eq.f32.partialorder %v873_v51, inf }
 0x152   :  { %571 = vmatmul.mubr.f32.gmra.mrb[8].mxu1 %v257_v23  ;;  %v259_v24 = vmul.f32 %v657_v22, %v221_v2  ;;  %672 = vrsqrt.f32 %v879_v58 }
 0x153   :  { %573 = vmatprep.mubr.msk.f32.mxu1 %vm777_vm0, %v775_v0 }
 0x154   :  { %v261_v25 = vsel %vm260_vm11, %v221_v2, %v259_v24  ;;  %vm355_vm11 = vcmp.eq.f32.partialorder %v873_v51, 0.0 }
 0x155   :  { %v659_v26 = vpop.eup %658  ;;  %v264_v27 = vsel %vm262_vm12, %v263_v1, %v261_v25  ;;  %vm360_vm12 = vcmp.eq.f32.partialorder %v879_v58, inf }
 0x156   :  { %574 = vmatmul.mubr.f32.gmra.mrb[10].mxu1 %v264_v27  ;;  %v266_v28 = vmul.f32 %v659_v26, %v222_v12  ;;  %v661_v40 = vpop.eup %660  ;;  %v356_v27 = vand.u32 2147483648, %v873_v51 }
 0x157   :  { %576 = vmatprep.mubr.msk.f32.mxu1 %vm777_vm0, %v775_v0  ;;  %v317_v43 = vmul.f32 %v661_v40, %v309_v33  ;;  %v663_v45 = vpop.eup %662  ;;  %vm320_vm0 = vcmp.eq.f32.partialorder %v309_v33, 0.0 }
 0x158   :  { %v268_v30 = vsel %vm267_vm13, %v222_v12, %v266_v28  ;;  %v324_v50 = vmul.f32 %v663_v45, %v310_v35  ;;  %v665_v52 = vpop.eup %664  ;;  %vm362_vm13 = vcmp.eq.f32.partialorder %v879_v58, 0.0 }
 0x159   :  { %v271_v31 = vsel %vm269_vm14, %v270_v29, %v268_v30  ;;  %v319_v49 = vsel %vm318_vm15, %v309_v33, %v317_v43  ;;  %v331_v59 = vmul.f32 %v665_v52, %v311_v37  ;;  %v667_v61 = vpop.eup %666 }
 0x15a   :  { %577 = vmatmul.mubr.f32.gmra.mrb[12].mxu1 %v271_v31  ;;  %v322_v54 = vsel %vm320_vm0, %v321_v48, %v319_v49  ;;  %v326_v57 = vsel %vm325_vm2, %v310_v35, %v324_v50  ;;  %v338_v6 = vmul.f32 %v667_v61, %v312_v41  ;;  %v669_v7 = vpop.eup %668  ;;  %v363_v35 = vand.u32 2147483648, %v879_v58 }
 0x15b   :  { %v370_v60 = vmul.f32 %v876_v55, %v322_v54  ;;  %v329_v62 = vsel %vm327_vm3, %v328_v56, %v326_v57  ;;  %v333_v2 = vsel %vm332_vm4, %v311_v37, %v331_v59  ;;  %v345_v14 = vmul.f32 %v669_v7, %v870_v46  ;;  %v671_v15 = vpop.eup %670 }
 0x15c   :  { %v371_v5 = vmul.f32 %v876_v55, %v329_v62  ;;  %v336_v9 = vsel %vm334_vm5, %v335_v3, %v333_v2  ;;  %v340_v13 = vsel %vm339_vm6, %v312_v41, %v338_v6  ;;  %v352_v23 = vmul.f32 %v671_v15, %v873_v51  ;;  %v673_v24 = vpop.eup %672 }
 0x15d   :  { %v372_v16 = vmul.f32 %v876_v55, %v336_v9  ;;  %v343_v18 = vsel %vm341_vm7, %v342_v10, %v340_v13  ;;  %v347_v22 = vsel %vm346_vm8, %v870_v46, %v345_v14  ;;  %v359_v31 = vmul.f32 %v673_v24, %v879_v58 }
 0x15e   :  { %v373_v1 = vmul.f32 %v876_v55, %v343_v18  ;;  %v350_v26 = vsel %vm348_vm9, %v349_v19, %v347_v22  ;;  %v354_v30 = vsel %vm353_vm10, %v873_v51, %v352_v23 }
 0x15f   :  { %v374_v32 = vmul.f32 %v876_v55, %v350_v26  ;;  %v357_v34 = vsel %vm355_vm11, %v356_v27, %v354_v30  ;;  %v361_v38 = vsel %vm360_vm12, %v879_v58, %v359_v31 }
 0x160   :  { %v375_v39 = vmul.f32 %v876_v55, %v357_v34  ;;  %v364_v41 = vsel %vm362_vm13, %v363_v35, %v361_v38 }
 0x161   :  { %v376_v44 = vmul.f32 %v876_v55, %v364_v41 }
 0x215   :  { %v443_v63 = vpop.f32.mrb[0].mxu1 }
 0x216   :  { %v444_v0 = vadd.f32 %v443_v63, %v370_v60  ;;  %v560_v4 = vpop.f32.mrb[1].mxu1 }
 0x218   :  { %477 = vst [vmem:[#allocation8] sm:$0xff] %v444_v0 }
 0x219   :  { %v448_v8 = vpop.f32.mrb[2].mxu1 }
 0x21a   :  { %v449_v11 = vadd.f32 %v448_v8, %v371_v5  ;;  %v563_v12 = vpop.f32.mrb[3].mxu1 }
 0x21c   :  { %478 = vst [vmem:[#allocation8 + $0x8] sm:$0xff] %v449_v11 }
 0x21d   :  { %v453_v17 = vpop.f32.mrb[4].mxu1 }
 0x21e   :  { %v454_v20 = vadd.f32 %v453_v17, %v372_v16  ;;  %v566_v21 = vpop.f32.mrb[5].mxu1 }
 0x220   :  { %479 = vst [vmem:[#allocation8 + $0x10] sm:$0xff] %v454_v20 }
 0x221   :  { %v458_v25 = vpop.f32.mrb[6].mxu1 }
 0x222   :  { %v459_v28 = vadd.f32 %v458_v25, %v373_v1  ;;  %v569_v29 = vpop.f32.mrb[7].mxu1 }
 0x224   :  { %480 = vst [vmem:[#allocation8 + $0x18] sm:$0xff] %v459_v28 }
 0x225   :  { %v463_v33 = vpop.f32.mrb[8].mxu1 }
 0x226   :  { %v464_v36 = vadd.f32 %v463_v33, %v374_v32  ;;  %v572_v37 = vpop.f32.mrb[9].mxu1 }
 0x228   :  { %481 = vst [vmem:[#allocation8 + $0x20] sm:$0xff] %v464_v36 }
 0x229   :  { %v468_v40 = vpop.f32.mrb[10].mxu1 }
 0x22a   :  { %v469_v42 = vadd.f32 %v468_v40, %v375_v39  ;;  %v575_v43 = vpop.f32.mrb[11].mxu1 }
 0x22c   :  { %482 = vst [vmem:[#allocation8 + $0x28] sm:$0xff] %v469_v42 }
 0x22d   :  { %v473_v45 = vpop.f32.mrb[12].mxu1 }
 0x22e   :  { %v474_v46 = vadd.f32 %v473_v45, %v376_v44  ;;  %v578_v47 = vpop.f32.mrb[13].mxu1 }
 0x230   :  { %483 = vst [vmem:[#allocation8 + $0x30] sm:$0xff] %v474_v46 }
 0x231   :  { %751 = shalt.err (!%p748_p0)
}
 0x232   :  { %s752_s27 = scalar_lea.hbm %s922_s3, 896 }
 0x233   :  { %p753_p1 = scmp.ne.s32.totalorder %s922_s3, %s752_s27  ;;  %p756_p2 = scmp.lt.u32.totalorder %s752_s27, %s922_s3 }
 0x235   :  { %p758_p3 = pnand %p756_p2, %p753_p1 }
 0x237   :  { %761 = shalt.err (!%p758_p3)
}
 0x238   :  { %495 = dma.vmem_to_hbm [thread:$0]  %s490_s23, 896, %s922_s3, [#allocation4], %s772_s1, %s772_s1, %s773_s9  }
 0x239   :  { %766 = dma.done.wait [#allocation4], 896  }
 0x23a   :  { %767 = vsyncadd [#allocation4], 4294966400 }
 0x23b   :  { %499 = vsyncpa [#allocation3], 1 }
 0x23c   :  { %500 = vsyncpa [#allocation6], 1 }
 0x23d   :  { %501 = vsyncpa [#allocation4], 1 }

</bundles_post_ra>
